<compile_context>
chip_gen: v6e
topology: v6e:2x2x1
jax: 0.10.0
libtpu: 0.0.40
codegen_flags: <defaults>
</compile_context>

<pallas_src>
import jax
import jax.numpy as jnp
from jax.experimental import pallas as pl
from jax.experimental.pallas import tpu as pltpu

VMEM_SPEC = pl.BlockSpec(memory_space=pltpu.MemorySpace.VMEM)


# ---------------- the single fused kernel ----------------

def _fused_forward_kernel(patches_ref, wconv_ref, lstmx_ref, whh_ref,
                          head1_ref, head2_ref, out_ref):
    f32 = jnp.float32
    N = wconv_ref.shape[0]                 # conv out channels == LSTM "batch"
    S = patches_ref.shape[1] // 4          # pooled positions = B*Hp*Wp = T*I
    Hd2, GH = whh_ref.shape                # (2*hidden, 8*hidden)
    Hd = Hd2 // 2
    TI = lstmx_ref.shape[0] - 1            # T*I (last row of lstmx is the bias row)
    T = lstmx_ref.shape[1] // GH           # sequence length (= input batch B)
    L1o = head1_ref.shape[1]

    # ---- Conv2d(50->N, KxK, pad) + bias in ONE matmul (bias rides on the ones-row of
    # the patch matrix).  Patch columns are pre-grouped by 2x2 pool corner, so
    # MaxPool2d(2,2) is just an elementwise max over the four lane quarters.
    # NOTE: per-channel bias commutes with max-pool and ReLU is monotone, so
    # relu(pool(conv + b)) == pool(relu(conv + b)) == PyTorch's Conv->ReLU->MaxPool.
    # TODO(synk): Dropout(p=0.5) between Conv and ReLU is identity (inference).
    conv = jnp.dot(wconv_ref[...], patches_ref[...],
                   preferred_element_type=f32)                        # (N, 4*S)
    pooled = jnp.maximum(jnp.maximum(conv[:, 0:S], conv[:, S:2 * S]),
                         jnp.maximum(conv[:, 2 * S:3 * S], conv[:, 3 * S:4 * S]))
    feat = jnp.maximum(pooled, 0.0)                                   # (N, T*I)

    # ---- LSTM x-projection for ALL steps & BOTH directions in one matmul.
    # Column block s holds the pre-activations step s needs, gate/dir order
    # [i_f,i_b,f_f,f_b,g_f,g_b,o_f,o_b]; forward reads time s, backward time T-1-s.
    gx = (jnp.dot(feat, lstmx_ref[0:TI, :], preferred_element_type=f32)
          + lstmx_ref[TI:TI + 1, :])                                  # (N, T*8Hd)

    # ---- Merged bidirectional recurrence: T serial steps instead of 2T.
    whh = whh_ref[...]                                                # hoisted load
    h = jnp.zeros((N, Hd2), f32)
    c = jnp.zeros((N, Hd2), f32)
    h_steps = []
    for s in range(T):                                                # tiny static T
        g = gx[:, s * GH:(s + 1) * GH] + jnp.dot(h, whh,
                                                 preferred_element_type=f32)
        i_g = jax.nn.sigmoid(g[:, 0 * Hd2:1 * Hd2])
        f_g = jax.nn.sigmoid(g[:, 1 * Hd2:2 * Hd2])
        g_g = jnp.tanh(g[:, 2 * Hd2:3 * Hd2])
        o_g = jax.nn.sigmoid(g[:, 3 * Hd2:4 * Hd2])
        c = f_g * c + i_g * g_g
        h = o_g * jnp.tanh(c)
        h_steps.append(h)                  # columns: [h_fwd(time s) | h_bwd(time T-1-s)]

    # ---- Flatten() into PyTorch order (T, N*2Hd): n-major, [fwd|bwd] within each n.
    # TODO(synk): static slice+concat flatten; switch to a reshape / stored-transposed
    # layout if N*T ever grows large.
    rows = []
    for t in range(T):
        parts = []
        for n in range(N):
            parts.append(h_steps[t][n:n + 1, 0:Hd])             # forward h at time t
            parts.append(h_steps[T - 1 - t][n:n + 1, Hd:Hd2])   # backward h at time t
        rows.append(jnp.concatenate(parts, axis=1))             # (1, N*2Hd)
    flat = jnp.concatenate(rows, axis=0)                        # (T, N*2Hd)

    # ---- Linear(N*2Hd -> L1o) as one K=256 matmul, ReLU, Linear(L1o -> 2), Softmax.
    NH = N * Hd2
    h1 = jnp.maximum(jnp.dot(flat, head1_ref[0:NH, :], preferred_element_type=f32)
                     + head1_ref[NH:NH + 1, :], 0.0)             # (T, L1o)
    logits = (jnp.dot(h1, head2_ref[0:L1o, :], preferred_element_type=f32)
              + head2_ref[L1o:L1o + 1, :])                       # (T, 2)
    m = jnp.max(logits, axis=-1, keepdims=True)
    e = jnp.exp(logits - m)
    out_ref[...] = e / jnp.sum(e, axis=-1, keepdims=True)


# ---------------- wrapper (layout plumbing + parameter packing only) ----------------

def mri_cnn_lstm_forward(x, params, cfg):
    B, Cin, H, W = x.shape
    K = cfg["con_kernel"]
    pad = cfg["con_padding"]
    Cout = cfg["con_out"]
    Hd = cfg["lstm_hidden"]
    f32 = jnp.float32

    Hc = H + 2 * pad - (K - 1)             # conv output spatial (stride 1)
    Wc = W + 2 * pad - (K - 1)
    assert Hc % 2 == 0 and Wc % 2 == 0, "MaxPool2d(2,2) needs even conv output"
    Hp, Wp = Hc // 2, Wc // 2
    T = B                                   # LSTM seq length (batch_first=False)
    N = Cout                                # LSTM batch = conv channels
    I = Hp * Wp                             # LSTM input size
    S = B * Hp * Wp                         # pooled positions = T*I
    assert cfg["lstm_in"] == I, "lstm_in must equal pooled Hp*Wp"
    assert cfg["linear_1_in"] == N * 2 * Hd, "linear_1_in must equal con_out*2*hidden"

    # ---- im2col patch matrix, columns grouped by 2x2 pool corner, plus a ones-row
    # carrying the conv bias (wrapper-side layout plumbing, no compute hoisting).
    xpad = jnp.pad(x.astype(f32), ((0, 0), (0, 0), (pad, pad), (pad, pad)))
    blocks = []
    for kh in range(K):
        for kw in range(K):
            sh = xpad[:, :, kh:kh + Hc, kw:kw + Wc]             # (B, Cin, Hc, Wc)
            s6 = sh.reshape(B, Cin, Hp, 2, Wp, 2)
            blocks.append(s6.transpose(1, 3, 5, 0, 2, 4).reshape(Cin, 4 * S))
    patches = jnp.concatenate(blocks + [jnp.ones((1, 4 * S), f32)], axis=0)
    KKC1 = K * K * Cin + 1
    KKC1p = ((KKC1 + 7) // 8) * 8                                # sublane-align K dim
    patches = jnp.pad(patches, ((0, KKC1p - KKC1), (0, 0)))      # (KKC1p, 4*S)

    wconv = params["conv_w"].transpose(0, 2, 3, 1).reshape(Cout, K * K * Cin)
    wconv = jnp.concatenate([wconv, params["conv_b"][:, None]], axis=1)
    wconv = jnp.pad(wconv, ((0, 0), (0, KKC1p - KKC1))).astype(f32)   # (Cout, KKC1p)

    # ---- LSTM x-side weights for the merged bidirectional recurrence.
    # Column block s (width 8Hd) projects feat onto step-s gate pre-activations with
    # gate/dir order [i_f,i_b,f_f,f_b,g_f,g_b,o_f,o_b]; forward uses time s, backward
    # uses time T-1-s.  Last row = summed LSTM biases (tiled over steps).
    wfT = params["w_ih_f"].T.astype(f32)                         # (I, 4Hd)
    wbT = params["w_ih_b"].T.astype(f32)
    bf = (params["b_ih_f"] + params["b_hh_f"]).astype(f32)       # (4Hd,)
    bb = (params["b_ih_b"] + params["b_hh_b"]).astype(f32)
    zc = jnp.zeros((I, Hd), f32)
    cols, bias_parts = [], []
    for s in range(T):
        for g in range(4):
            cols.append(jnp.concatenate(
                [wfT[:, g * Hd:(g + 1) * Hd] if t == s else zc for t in range(T)],
                axis=0))
            cols.append(jnp.concatenate(
                [wbT[:, g * Hd:(g + 1) * Hd] if t == T - 1 - s else zc for t in range(T)],
                axis=0))
            bias_parts += [bf[g * Hd:(g + 1) * Hd], bb[g * Hd:(g + 1) * Hd]]
    lstmx = jnp.concatenate(
        [jnp.concatenate(cols, axis=1), jnp.concatenate(bias_parts)[None, :]],
        axis=0)                                                  # (T*I + 1, T*8Hd)

    # Block-diagonal recurrent weights, same gate/dir column order.
    whfT = params["w_hh_f"].T.astype(f32)                        # (Hd, 4Hd)
    whbT = params["w_hh_b"].T.astype(f32)
    zh = jnp.zeros((Hd, Hd), f32)
    hcols = []
    for g in range(4):
        hcols.append(jnp.concatenate([whfT[:, g * Hd:(g + 1) * Hd], zh], axis=0))
        hcols.append(jnp.concatenate([zh, whbT[:, g * Hd:(g + 1) * Hd]], axis=0))
    whh = jnp.concatenate(hcols, axis=1)                         # (2Hd, 8Hd)

    # ---- Head buffers: Linear1 (weights + bias row) and Linear2 (weights + bias row).
    head1 = jnp.concatenate([params["lin1_w"].T, params["lin1_b"][None, :]],
                            axis=0).astype(f32)                  # (N*2Hd + 1, L1o)
    head2 = jnp.concatenate([params["lin2_w"].T, params["lin2_b"][None, :]],
                            axis=0).astype(f32)                  # (L1o + 1, 2)

    # Whole model is a few hundred KB -> single gridless, whole-in-VMEM pallas_call.
    # TODO(synk): if batch / volume count grows, add a leading grid axis with
    # dimension_semantics=("parallel", ...) so v7x's second TensorCore is used.
    return pl.pallas_call(
        _fused_forward_kernel,
        out_shape=jax.ShapeDtypeStruct((T, 2), f32),
        in_specs=[VMEM_SPEC] * 6,
        out_specs=VMEM_SPEC,
    )(patches, wconv, lstmx, whh, head1, head2)


# ---------------- pure-JAX reference for validation ----------------

def reference_forward(x, params, cfg):
    pad = cfg["con_padding"]
    Hd = cfg["lstm_hidden"]
    hi = jax.lax.Precision.HIGHEST

    y = jax.lax.conv_general_dilated(
        x, params["conv_w"], window_strides=(1, 1),
        padding=[(pad, pad), (pad, pad)],
        dimension_numbers=("NCHW", "OIHW", "NCHW"), precision=hi)
    y = y + params["conv_b"][None, :, None, None]
    y = jnp.maximum(y, 0.0)
    B, C, H, W = y.shape
    y = y.reshape(B, C, H // 2, 2, W // 2, 2).max(axis=(3, 5))
    feat = y.reshape(B, C, -1)

    T, N, _ = feat.shape

    def lstm_dir(wih, whh, bias, reverse):
        h = jnp.zeros((N, Hd), jnp.float32)
        c = jnp.zeros((N, Hd), jnp.float32)
        outs = [None] * T
        order = range(T - 1, -1, -1) if reverse else range(T)
        for t in order:
            g = (jnp.dot(feat[t], wih.T, precision=hi)
                 + jnp.dot(h, whh.T, precision=hi) + bias)
            i_g = jax.nn.sigmoid(g[:, 0 * Hd:1 * Hd])
            f_g = jax.nn.sigmoid(g[:, 1 * Hd:2 * Hd])
            g_g = jnp.tanh(g[:, 2 * Hd:3 * Hd])
            o_g = jax.nn.sigmoid(g[:, 3 * Hd:4 * Hd])
            c = f_g * c + i_g * g_g
            h = o_g * jnp.tanh(c)
            outs[t] = h
        return jnp.stack(outs, axis=0)

    out_f = lstm_dir(params["w_ih_f"], params["w_hh_f"],
                     params["b_ih_f"] + params["b_hh_f"], reverse=False)
    out_b = lstm_dir(params["w_ih_b"], params["w_hh_b"],
                     params["b_ih_b"] + params["b_hh_b"], reverse=True)
    lstm_out = jnp.concatenate([out_f, out_b], axis=-1)

    flat = lstm_out.reshape(T, -1)
    h1 = jnp.maximum(jnp.dot(flat, params["lin1_w"].T, precision=hi)
                     + params["lin1_b"], 0.0)
    logits = jnp.dot(h1, params["lin2_w"].T, precision=hi) + params["lin2_b"]
    return jax.nn.softmax(logits, axis=1)


# ---------------- parameter init & main ----------------

def init_params(key, cfg):
    Cin = 50
    Cout = cfg["con_out"]
    k = cfg["con_kernel"]
    I = cfg["lstm_in"]
    Hd = cfg["lstm_hidden"]
    L1i = cfg["linear_1_in"]
    L1o = cfg["linear_1_out"]

    keys = jax.random.split(key, 16)
    s = 0.1
    return {
        "conv_w": jax.random.normal(keys[0], (Cout, Cin, k, k), jnp.float32) * s,
        "conv_b": jax.random.normal(keys[1], (Cout,), jnp.float32) * s,
        "w_ih_f": jax.random.normal(keys[2], (4 * Hd, I), jnp.float32) * s,
        "w_hh_f": jax.random.normal(keys[3], (4 * Hd, Hd), jnp.float32) * s,
        "b_ih_f": jax.random.normal(keys[4], (4 * Hd,), jnp.float32) * s,
        "b_hh_f": jax.random.normal(keys[5], (4 * Hd,), jnp.float32) * s,
        "w_ih_b": jax.random.normal(keys[6], (4 * Hd, I), jnp.float32) * s,
        "w_hh_b": jax.random.normal(keys[7], (4 * Hd, Hd), jnp.float32) * s,
        "b_ih_b": jax.random.normal(keys[8], (4 * Hd,), jnp.float32) * s,
        "b_hh_b": jax.random.normal(keys[9], (4 * Hd,), jnp.float32) * s,
        "lin1_w": jax.random.normal(keys[10], (L1o, L1i), jnp.float32) * s,
        "lin1_b": jax.random.normal(keys[11], (L1o,), jnp.float32) * s,
        "lin2_w": jax.random.normal(keys[12], (2, L1o), jnp.float32) * s,
        "lin2_b": jax.random.normal(keys[13], (2,), jnp.float32) * s,
    }


if __name__ == "__main__":
    # x: (B=2, 50, 8, 8); Conv2d(50->4, 3x3, pad=1) -> (2, 4, 8, 8); MaxPool -> (2, 4, 4, 4);
    # Flatten(2) -> (2, 4, 16); LSTM(16, 32, bidir) -> (2, 4, 64); Flatten -> (2, 256);
    # Linear(256, 32) -> ReLU -> Linear(32, 2) -> Softmax -> (2, 2).
    cfg = dict(con_out=4, con_kernel=3, con_padding=1,
               lstm_in=16, lstm_hidden=32,
               linear_1_in=256, linear_1_out=32)

    key = jax.random.PRNGKey(0)
    kx, kp = jax.random.split(key)
    x = jax.random.normal(kx, (2, 50, 8, 8), jnp.float32)
    params = init_params(kp, cfg)

    fwd = jax.jit(lambda xx, pp: mri_cnn_lstm_forward(xx, pp, cfg))
    out = jax.block_until_ready(fwd(x, params))
    ref = jax.block_until_ready(reference_forward(x, params, cfg))

    assert out.shape == (2, 2), out.shape
    max_diff = float(jnp.max(jnp.abs(out - ref)))
    assert max_diff < 1e-3, f"mismatch vs reference: {max_diff}"
    print("KERNEL_OK")
</pallas_src>

<mosaic_0001>
module attributes {stable_mosaic.version = 11 : i64} {
  func.func @_fused_forward_kernel(%arg0: memref<456x128xf32, #tpu.memory_space<vmem>>, %arg1: memref<4x456xf32, #tpu.memory_space<vmem>>, %arg2: memref<33x512xf32, #tpu.memory_space<vmem>>, %arg3: memref<64x256xf32, #tpu.memory_space<vmem>>, %arg4: memref<257x32xf32, #tpu.memory_space<vmem>>, %arg5: memref<33x2xf32, #tpu.memory_space<vmem>>, %arg6: memref<2x2xf32, #tpu.memory_space<vmem>>) attributes {dimension_semantics = [], scalar_prefetch = 0 : i64, scratch_operands = 0 : i64, tpu.core_type = #tpu.core_type<tc>} {
    %c0 = arith.constant 0 : index
    %c0_0 = arith.constant 0 : index
    %0 = vector.load %arg1[%c0, %c0_0] : memref<4x456xf32, #tpu.memory_space<vmem>>, vector<4x456xf32>
    %c0_1 = arith.constant 0 : index
    %c0_2 = arith.constant 0 : index
    %1 = vector.load %arg0[%c0_1, %c0_2] : memref<456x128xf32, #tpu.memory_space<vmem>>, vector<456x128xf32>
    %cst = arith.constant dense<0.000000e+00> : vector<4x128xf32>
    %2 = tpu.matmul %0, %1, %cst {dimension_numbers = #tpu.dot_dimension_numbers<[1], [0], [0], [1], [0, 0, 1, 1], [], []>} : vector<4x456xf32>, vector<456x128xf32>, vector<4x128xf32> -> vector<4x128xf32>
    %3 = vector.extract_strided_slice %2 {offsets = [0, 0], sizes = [4, 32], strides = [1, 1]} : vector<4x128xf32> to vector<4x32xf32>
    %4 = vector.extract_strided_slice %2 {offsets = [0, 32], sizes = [4, 32], strides = [1, 1]} : vector<4x128xf32> to vector<4x32xf32>
    %5 = arith.maximumf %3, %4 : vector<4x32xf32>
    %6 = vector.extract_strided_slice %2 {offsets = [0, 64], sizes = [4, 32], strides = [1, 1]} : vector<4x128xf32> to vector<4x32xf32>
    %7 = vector.extract_strided_slice %2 {offsets = [0, 96], sizes = [4, 32], strides = [1, 1]} : vector<4x128xf32> to vector<4x32xf32>
    %8 = arith.maximumf %6, %7 : vector<4x32xf32>
    %9 = arith.maximumf %5, %8 : vector<4x32xf32>
    %cst_3 = arith.constant 0.000000e+00 : f32
    %10 = vector.broadcast %cst_3 : f32 to vector<4x32xf32>
    %11 = arith.maximumf %9, %10 : vector<4x32xf32>
    %c0_4 = arith.constant 0 : index
    %c0_5 = arith.constant 0 : index
    %12 = vector.load %arg2[%c0_4, %c0_5] : memref<33x512xf32, #tpu.memory_space<vmem>>, vector<32x512xf32>
    %cst_6 = arith.constant dense<0.000000e+00> : vector<4x512xf32>
    %13 = tpu.matmul %11, %12, %cst_6 {dimension_numbers = #tpu.dot_dimension_numbers<[1], [0], [0], [1], [0, 0, 1, 1], [], []>} : vector<4x32xf32>, vector<32x512xf32>, vector<4x512xf32> -> vector<4x512xf32>
    %c32 = arith.constant 32 : index
    %c0_7 = arith.constant 0 : index
    %14 = vector.load %arg2[%c32, %c0_7] : memref<33x512xf32, #tpu.memory_space<vmem>>, vector<1x512xf32>
    %15 = vector.broadcast %14 : vector<1x512xf32> to vector<4x512xf32>
    %16 = arith.addf %13, %15 : vector<4x512xf32>
    %c0_8 = arith.constant 0 : index
    %c0_9 = arith.constant 0 : index
    %17 = vector.load %arg3[%c0_8, %c0_9] : memref<64x256xf32, #tpu.memory_space<vmem>>, vector<64x256xf32>
    %cst_10 = arith.constant 0.000000e+00 : f32
    %18 = vector.broadcast %cst_10 : f32 to vector<4x64xf32>
    %cst_11 = arith.constant 0.000000e+00 : f32
    %19 = vector.broadcast %cst_11 : f32 to vector<4x64xf32>
    %20 = vector.extract_strided_slice %16 {offsets = [0, 0], sizes = [4, 256], strides = [1, 1]} : vector<4x512xf32> to vector<4x256xf32>
    %cst_12 = arith.constant dense<0.000000e+00> : vector<4x256xf32>
    %21 = tpu.matmul %18, %17, %cst_12 {dimension_numbers = #tpu.dot_dimension_numbers<[1], [0], [0], [1], [0, 0, 1, 1], [], []>} : vector<4x64xf32>, vector<64x256xf32>, vector<4x256xf32> -> vector<4x256xf32>
    %22 = arith.addf %20, %21 : vector<4x256xf32>
    %23 = vector.extract_strided_slice %22 {offsets = [0, 0], sizes = [4, 64], strides = [1, 1]} : vector<4x256xf32> to vector<4x64xf32>
    %24 = arith.negf %23 : vector<4x64xf32>
    %25 = math.exp %24 : vector<4x64xf32>
    %cst_13 = arith.constant 1.000000e+00 : f32
    %26 = vector.broadcast %cst_13 : f32 to vector<4x64xf32>
    %27 = arith.addf %26, %25 : vector<4x64xf32>
    %28 = arith.divf %26, %27 : vector<4x64xf32>
    %29 = vector.extract_strided_slice %22 {offsets = [0, 64], sizes = [4, 64], strides = [1, 1]} : vector<4x256xf32> to vector<4x64xf32>
    %30 = arith.negf %29 : vector<4x64xf32>
    %31 = math.exp %30 : vector<4x64xf32>
    %cst_14 = arith.constant 1.000000e+00 : f32
    %32 = vector.broadcast %cst_14 : f32 to vector<4x64xf32>
    %33 = arith.addf %32, %31 : vector<4x64xf32>
    %34 = arith.divf %32, %33 : vector<4x64xf32>
    %35 = vector.extract_strided_slice %22 {offsets = [0, 128], sizes = [4, 64], strides = [1, 1]} : vector<4x256xf32> to vector<4x64xf32>
    %36 = math.tanh %35 : vector<4x64xf32>
    %37 = vector.extract_strided_slice %22 {offsets = [0, 192], sizes = [4, 64], strides = [1, 1]} : vector<4x256xf32> to vector<4x64xf32>
    %38 = arith.negf %37 : vector<4x64xf32>
    %39 = math.exp %38 : vector<4x64xf32>
    %cst_15 = arith.constant 1.000000e+00 : f32
    %40 = vector.broadcast %cst_15 : f32 to vector<4x64xf32>
    %41 = arith.addf %40, %39 : vector<4x64xf32>
    %42 = arith.divf %40, %41 : vector<4x64xf32>
    %43 = arith.mulf %34, %19 : vector<4x64xf32>
    %44 = arith.mulf %28, %36 : vector<4x64xf32>
    %45 = arith.addf %43, %44 : vector<4x64xf32>
    %46 = math.tanh %45 : vector<4x64xf32>
    %47 = arith.mulf %42, %46 : vector<4x64xf32>
    %48 = vector.extract_strided_slice %16 {offsets = [0, 256], sizes = [4, 256], strides = [1, 1]} : vector<4x512xf32> to vector<4x256xf32>
    %cst_16 = arith.constant dense<0.000000e+00> : vector<4x256xf32>
    %49 = tpu.matmul %47, %17, %cst_16 {dimension_numbers = #tpu.dot_dimension_numbers<[1], [0], [0], [1], [0, 0, 1, 1], [], []>} : vector<4x64xf32>, vector<64x256xf32>, vector<4x256xf32> -> vector<4x256xf32>
    %50 = arith.addf %48, %49 : vector<4x256xf32>
    %51 = vector.extract_strided_slice %50 {offsets = [0, 0], sizes = [4, 64], strides = [1, 1]} : vector<4x256xf32> to vector<4x64xf32>
    %52 = arith.negf %51 : vector<4x64xf32>
    %53 = math.exp %52 : vector<4x64xf32>
    %cst_17 = arith.constant 1.000000e+00 : f32
    %54 = vector.broadcast %cst_17 : f32 to vector<4x64xf32>
    %55 = arith.addf %54, %53 : vector<4x64xf32>
    %56 = arith.divf %54, %55 : vector<4x64xf32>
    %57 = vector.extract_strided_slice %50 {offsets = [0, 64], sizes = [4, 64], strides = [1, 1]} : vector<4x256xf32> to vector<4x64xf32>
    %58 = arith.negf %57 : vector<4x64xf32>
    %59 = math.exp %58 : vector<4x64xf32>
    %cst_18 = arith.constant 1.000000e+00 : f32
    %60 = vector.broadcast %cst_18 : f32 to vector<4x64xf32>
    %61 = arith.addf %60, %59 : vector<4x64xf32>
    %62 = arith.divf %60, %61 : vector<4x64xf32>
    %63 = vector.extract_strided_slice %50 {offsets = [0, 128], sizes = [4, 64], strides = [1, 1]} : vector<4x256xf32> to vector<4x64xf32>
    %64 = math.tanh %63 : vector<4x64xf32>
    %65 = vector.extract_strided_slice %50 {offsets = [0, 192], sizes = [4, 64], strides = [1, 1]} : vector<4x256xf32> to vector<4x64xf32>
    %66 = arith.negf %65 : vector<4x64xf32>
    %67 = math.exp %66 : vector<4x64xf32>
    %cst_19 = arith.constant 1.000000e+00 : f32
    %68 = vector.broadcast %cst_19 : f32 to vector<4x64xf32>
    %69 = arith.addf %68, %67 : vector<4x64xf32>
    %70 = arith.divf %68, %69 : vector<4x64xf32>
    %71 = arith.mulf %62, %45 : vector<4x64xf32>
    %72 = arith.mulf %56, %64 : vector<4x64xf32>
    %73 = arith.addf %71, %72 : vector<4x64xf32>
    %74 = math.tanh %73 : vector<4x64xf32>
    %75 = arith.mulf %70, %74 : vector<4x64xf32>
    %76 = vector.extract_strided_slice %47 {offsets = [0, 0], sizes = [1, 32], strides = [1, 1]} : vector<4x64xf32> to vector<1x32xf32>
    %77 = vector.extract_strided_slice %75 {offsets = [0, 32], sizes = [1, 32], strides = [1, 1]} : vector<4x64xf32> to vector<1x32xf32>
    %78 = vector.extract_strided_slice %47 {offsets = [1, 0], sizes = [1, 32], strides = [1, 1]} : vector<4x64xf32> to vector<1x32xf32>
    %79 = vector.extract_strided_slice %75 {offsets = [1, 32], sizes = [1, 32], strides = [1, 1]} : vector<4x64xf32> to vector<1x32xf32>
    %80 = vector.extract_strided_slice %47 {offsets = [2, 0], sizes = [1, 32], strides = [1, 1]} : vector<4x64xf32> to vector<1x32xf32>
    %81 = vector.extract_strided_slice %75 {offsets = [2, 32], sizes = [1, 32], strides = [1, 1]} : vector<4x64xf32> to vector<1x32xf32>
    %82 = vector.extract_strided_slice %47 {offsets = [3, 0], sizes = [1, 32], strides = [1, 1]} : vector<4x64xf32> to vector<1x32xf32>
    %83 = vector.extract_strided_slice %75 {offsets = [3, 32], sizes = [1, 32], strides = [1, 1]} : vector<4x64xf32> to vector<1x32xf32>
    %84 = tpu.concatenate %76, %77, %78, %79, %80, %81, %82, %83 in 1 : vector<1x32xf32>, vector<1x32xf32>, vector<1x32xf32>, vector<1x32xf32>, vector<1x32xf32>, vector<1x32xf32>, vector<1x32xf32>, vector<1x32xf32> -> vector<1x256xf32>
    %85 = vector.extract_strided_slice %75 {offsets = [0, 0], sizes = [1, 32], strides = [1, 1]} : vector<4x64xf32> to vector<1x32xf32>
    %86 = vector.extract_strided_slice %47 {offsets = [0, 32], sizes = [1, 32], strides = [1, 1]} : vector<4x64xf32> to vector<1x32xf32>
    %87 = vector.extract_strided_slice %75 {offsets = [1, 0], sizes = [1, 32], strides = [1, 1]} : vector<4x64xf32> to vector<1x32xf32>
    %88 = vector.extract_strided_slice %47 {offsets = [1, 32], sizes = [1, 32], strides = [1, 1]} : vector<4x64xf32> to vector<1x32xf32>
    %89 = vector.extract_strided_slice %75 {offsets = [2, 0], sizes = [1, 32], strides = [1, 1]} : vector<4x64xf32> to vector<1x32xf32>
    %90 = vector.extract_strided_slice %47 {offsets = [2, 32], sizes = [1, 32], strides = [1, 1]} : vector<4x64xf32> to vector<1x32xf32>
    %91 = vector.extract_strided_slice %75 {offsets = [3, 0], sizes = [1, 32], strides = [1, 1]} : vector<4x64xf32> to vector<1x32xf32>
    %92 = vector.extract_strided_slice %47 {offsets = [3, 32], sizes = [1, 32], strides = [1, 1]} : vector<4x64xf32> to vector<1x32xf32>
    %93 = tpu.concatenate %85, %86, %87, %88, %89, %90, %91, %92 in 1 : vector<1x32xf32>, vector<1x32xf32>, vector<1x32xf32>, vector<1x32xf32>, vector<1x32xf32>, vector<1x32xf32>, vector<1x32xf32>, vector<1x32xf32> -> vector<1x256xf32>
    %94 = tpu.concatenate %84, %93 in 0 : vector<1x256xf32>, vector<1x256xf32> -> vector<2x256xf32>
    %c0_20 = arith.constant 0 : index
    %c0_21 = arith.constant 0 : index
    %95 = vector.load %arg4[%c0_20, %c0_21] : memref<257x32xf32, #tpu.memory_space<vmem>>, vector<256x32xf32>
    %cst_22 = arith.constant dense<0.000000e+00> : vector<2x32xf32>
    %96 = tpu.matmul %94, %95, %cst_22 {dimension_numbers = #tpu.dot_dimension_numbers<[1], [0], [0], [1], [0, 0, 1, 1], [], []>} : vector<2x256xf32>, vector<256x32xf32>, vector<2x32xf32> -> vector<2x32xf32>
    %c256 = arith.constant 256 : index
    %c0_23 = arith.constant 0 : index
    %97 = vector.load %arg4[%c256, %c0_23] : memref<257x32xf32, #tpu.memory_space<vmem>>, vector<1x32xf32>
    %98 = vector.broadcast %97 : vector<1x32xf32> to vector<2x32xf32>
    %99 = arith.addf %96, %98 : vector<2x32xf32>
    %cst_24 = arith.constant 0.000000e+00 : f32
    %100 = vector.broadcast %cst_24 : f32 to vector<2x32xf32>
    %101 = arith.maximumf %99, %100 : vector<2x32xf32>
    %c0_25 = arith.constant 0 : index
    %c0_26 = arith.constant 0 : index
    %102 = vector.load %arg5[%c0_25, %c0_26] : memref<33x2xf32, #tpu.memory_space<vmem>>, vector<32x2xf32>
    %cst_27 = arith.constant dense<0.000000e+00> : vector<2x2xf32>
    %103 = tpu.matmul %101, %102, %cst_27 {dimension_numbers = #tpu.dot_dimension_numbers<[1], [0], [0], [1], [0, 0, 1, 1], [], []>} : vector<2x32xf32>, vector<32x2xf32>, vector<2x2xf32> -> vector<2x2xf32>
    %c32_28 = arith.constant 32 : index
    %c0_29 = arith.constant 0 : index
    %104 = vector.load %arg5[%c32_28, %c0_29] : memref<33x2xf32, #tpu.memory_space<vmem>>, vector<1x2xf32>
    %105 = vector.broadcast %104 : vector<1x2xf32> to vector<2x2xf32>
    %106 = arith.addf %103, %105 : vector<2x2xf32>
    %cst_30 = arith.constant dense<0xFF800000> : vector<2xf32>
    %107 = vector.multi_reduction <maximumf>, %106, %cst_30 [1] : vector<2x2xf32> to vector<2xf32>
    %108 = vector.shape_cast %107 : vector<2xf32> to vector<2x1xf32>
    %109 = vector.broadcast %108 : vector<2x1xf32> to vector<2x2xf32>
    %110 = arith.subf %106, %109 : vector<2x2xf32>
    %111 = math.exp %110 : vector<2x2xf32>
    %cst_31 = arith.constant dense<0.000000e+00> : vector<2xf32>
    %112 = vector.multi_reduction <add>, %111, %cst_31 [1] : vector<2x2xf32> to vector<2xf32>
    %113 = vector.shape_cast %112 : vector<2xf32> to vector<2x1xf32>
    %114 = vector.broadcast %113 : vector<2x1xf32> to vector<2x2xf32>
    %115 = arith.divf %111, %114 : vector<2x2xf32>
    %c0_32 = arith.constant 0 : index
    %c0_33 = arith.constant 0 : index
    %116 = vector.load %arg6[%c0_32, %c0_33] : memref<2x2xf32, #tpu.memory_space<vmem>>, vector<2x2xf32>
    tpu.vector_store %arg6[%c0_32, %c0_33], %115 {strides = array<i32>} : memref<2x2xf32, #tpu.memory_space<vmem>>, vector<2x2xf32>,
    return
  }
}

</mosaic_0001>

<bundles_post_ra>
// kernel: _lambda_.1
= control target key start
LH: loop header
LB: loop body
LE: loop exit
PB: predicated region body
PF: predicated region fallthrough
CT: control target
= control target key end

     0   :  { %v1062_v1 = vmov 0.0   ;;  %s1572_s0 = inlined_call_operand.vmem [shape: f32[456,128], index: 0, kind: input, shape index: {}]   ;;  %s1573_s1 = inlined_call_operand.vmem [shape: f32[4,456], index: 1, kind: input, shape index: {}]   ;;  %s1574_s2 = inlined_call_operand.vmem [shape: f32[33,512], index: 2, kind: input, shape index: {}]   ;;  %s1575_s3 = inlined_call_operand.vmem [shape: f32[64,256], index: 3, kind: input, shape index: {}]   ;;  %s1576_s4 = inlined_call_operand.vmem [shape: f32[257,32], index: 4, kind: input, shape index: {}]   ;;  %s1577_s5 = inlined_call_operand.vmem [shape: f32[33,2], index: 5, kind: input, shape index: {}]   ;;  %s1578_s6 = inlined_call_operand.hbm [shape: f32[2,2], index: 6, kind: output, shape index: {}]  }
   0x1   :  { %v73_v0 = vld [vmem:[%s1572_s0 + $0x178] sm:$0xff]  ;;  %161 = vmatprep.subr.mxu1 %v1062_v1  ;;  %v72_v2 = vld [vmem:[%s1572_s0 + $0x170] sm:$0xff]  ;;  %v71_v5 = vld [vmem:[%s1572_s0 + $0x168] sm:$0xff] }
   0x2   :  { %162 = vmatpush1.msra.mxu1 %v73_v0  ;;  %v57_v3 = vld [vmem:[%s1572_s0 + $0xf8] sm:$0xff]  ;;  %v56_v6 = vld [vmem:[%s1572_s0 + $0xf0] sm:$0xff]  ;;  %v55_v8 = vld [vmem:[%s1572_s0 + $0xe8] sm:$0xff] }
   0x3   :  { %v41_v4 = vld [vmem:[%s1572_s0 + $0x78] sm:$0xff]  ;;  %163 = vmatprep.subr.mxu1 %v1062_v1  ;;  %914 = vmatprep.subr.mxu0 %v57_v3  ;;  %v40_v7 = vld [vmem:[%s1572_s0 + $0x70] sm:$0xff]  ;;  %v70_v9 = vld [vmem:[%s1572_s0 + $0x160] sm:$0xff] }
   0x4   :  { %164 = vmatpush1.msra.mxu1 %v72_v2  ;;  %915 = vmatpush3.msra.mxu0 %v41_v4  ;;  %v39_v10 = vld [vmem:[%s1572_s0 + $0x68] sm:$0xff]  ;;  %v54_v11 = vld [vmem:[%s1572_s0 + $0xe0] sm:$0xff]  ;;  %v69_v12 = vld [vmem:[%s1572_s0 + $0x158] sm:$0xff] }
   0x5   :  { %165 = vmatprep.subr.mxu1 %v1062_v1  ;;  %916 = vmatprep.subr.mxu0 %v56_v6  ;;  %v38_v13 = vld [vmem:[%s1572_s0 + $0x60] sm:$0xff]  ;;  %v53_v14 = vld [vmem:[%s1572_s0 + $0xd8] sm:$0xff]  ;;  %v68_v15 = vld [vmem:[%s1572_s0 + $0x150] sm:$0xff] }
   0x6   :  { %166 = vmatpush1.msra.mxu1 %v71_v5  ;;  %917 = vmatpush3.msra.mxu0 %v40_v7  ;;  %v37_v16 = vld [vmem:[%s1572_s0 + $0x58] sm:$0xff]  ;;  %v52_v17 = vld [vmem:[%s1572_s0 + $0xd0] sm:$0xff]  ;;  %v67_v18 = vld [vmem:[%s1572_s0 + $0x148] sm:$0xff] }
   0x7   :  { %167 = vmatprep.subr.mxu1 %v1062_v1  ;;  %918 = vmatprep.subr.mxu0 %v55_v8  ;;  %v36_v19 = vld [vmem:[%s1572_s0 + $0x50] sm:$0xff]  ;;  %v51_v20 = vld [vmem:[%s1572_s0 + $0xc8] sm:$0xff]  ;;  %v66_v21 = vld [vmem:[%s1572_s0 + $0x140] sm:$0xff] }
   0x8   :  { %168 = vmatpush1.msra.mxu1 %v70_v9  ;;  %919 = vmatpush3.msra.mxu0 %v39_v10  ;;  %v35_v22 = vld [vmem:[%s1572_s0 + $0x48] sm:$0xff]  ;;  %v50_v23 = vld [vmem:[%s1572_s0 + $0xc0] sm:$0xff]  ;;  %v65_v24 = vld [vmem:[%s1572_s0 + $0x138] sm:$0xff] }
   0x9   :  { %169 = vmatprep.subr.mxu1 %v1062_v1  ;;  %920 = vmatprep.subr.mxu0 %v54_v11  ;;  %v34_v25 = vld [vmem:[%s1572_s0 + $0x40] sm:$0xff]  ;;  %v49_v26 = vld [vmem:[%s1572_s0 + $0xb8] sm:$0xff]  ;;  %v64_v27 = vld [vmem:[%s1572_s0 + $0x130] sm:$0xff] }
   0xa   :  { %170 = vmatpush1.msra.mxu1 %v69_v12  ;;  %921 = vmatpush3.msra.mxu0 %v38_v13  ;;  %v33_v28 = vld [vmem:[%s1572_s0 + $0x38] sm:$0xff]  ;;  %v48_v29 = vld [vmem:[%s1572_s0 + $0xb0] sm:$0xff]  ;;  %v63_v30 = vld [vmem:[%s1572_s0 + $0x128] sm:$0xff] }
   0xb   :  { %171 = vmatprep.subr.mxu1 %v1062_v1  ;;  %922 = vmatprep.subr.mxu0 %v53_v14  ;;  %v32_v31 = vld [vmem:[%s1572_s0 + $0x30] sm:$0xff] }
   0xc   :  { %172 = vmatpush1.msra.mxu1 %v68_v15  ;;  %923 = vmatpush3.msra.mxu0 %v37_v16 }
   0xd   :  { %173 = vmatprep.subr.mxu1 %v1062_v1  ;;  %924 = vmatprep.subr.mxu0 %v52_v17 }
   0xe   :  { %174 = vmatpush1.msra.mxu1 %v67_v18  ;;  %925 = vmatpush3.msra.mxu0 %v36_v19 }
   0xf   :  { %175 = vmatprep.subr.mxu1 %v1062_v1  ;;  %926 = vmatprep.subr.mxu0 %v51_v20 }
  0x10   :  { %176 = vmatpush1.msra.mxu1 %v66_v21  ;;  %927 = vmatpush3.msra.mxu0 %v35_v22 }
  0x11   :  { %177 = vmatprep.subr.mxu1 %v1062_v1  ;;  %928 = vmatprep.subr.mxu0 %v50_v23 }
  0x12   :  { %178 = vmatpush1.msra.mxu1 %v65_v24  ;;  %929 = vmatpush3.msra.mxu0 %v34_v25 }
  0x13   :  { %179 = vmatprep.subr.mxu1 %v1062_v1  ;;  %930 = vmatprep.subr.mxu0 %v49_v26 }
  0x14   :  { %11 = vsyncpa [#allocation3], 0  ;;  %180 = vmatpush1.msra.mxu1 %v64_v27  ;;  %931 = vmatpush3.msra.mxu0 %v33_v28  ;;  %v47_v32 = vld [vmem:[%s1572_s0 + $0xa8] sm:$0xff]  ;;  %v62_v33 = vld [vmem:[%s1572_s0 + $0x120] sm:$0xff]  ;;  %vm88_vm0 = vcmask 588800   ;;  %s1063_s10 = smov 96  }
  0x15   :  { %181 = vmatprep.subr.mxu1 %v1062_v1  ;;  %932 = vmatprep.subr.mxu0 %v48_v29  ;;  %v31_v34 = vld [vmem:[%s1572_s0 + $0x28] sm:$0xff]  ;;  %v46_v35 = vld [vmem:[%s1572_s0 + $0xa0] sm:$0xff]  ;;  %v61_v36 = vld [vmem:[%s1572_s0 + $0x118] sm:$0xff]  ;;  %s1064_s26 = smov 64   ;;  %vm281_vm1 = vcmask 261120   ;;  %vm443_vm2 = vcmask 523264  }
  0x16   :  { %182 = vmatpush1.msra.mxu1 %v63_v30  ;;  %933 = vmatpush3.msra.mxu0 %v32_v31  ;;  %v30_v37 = vld [vmem:[%s1572_s0 + $0x20] sm:$0xff]  ;;  %v45_v38 = vld [vmem:[%s1572_s0 + $0x98] sm:$0xff]  ;;  %v60_v39 = vld [vmem:[%s1572_s0 + $0x110] sm:$0xff]  ;;  %vm665_vm3 = vcmask 785408   ;;  %vm682_vm4 = vcmask 1040384   ;;  %vm1065_vm5 = vmmov 0  }
  0x17   :  { %183 = vmatprep.subr.mxu1 %v1062_v1  ;;  %934 = vmatprep.subr.mxu0 %v47_v32  ;;  %v29_v40 = vld [vmem:[%s1572_s0 + $0x18] sm:$0xff]  ;;  %v44_v41 = vld [vmem:[%s1572_s0 + $0x90] sm:$0xff]  ;;  %v59_v42 = vld [vmem:[%s1572_s0 + $0x108] sm:$0xff]  ;;  %vm875_vm6 = vcmask 9216  }
  0x18   :  { %184 = vmatpush1.msra.mxu1 %v62_v33  ;;  %935 = vmatpush3.msra.mxu0 %v31_v34  ;;  %v28_v43 = vld [vmem:[%s1572_s0 + $0x10] sm:$0xff]  ;;  %v43_v44 = vld [vmem:[%s1572_s0 + $0x88] sm:$0xff]  ;;  %v24_v45 = vld [vmem:[%s1573_s1] sm:$0xff] }
  0x19   :  { %185 = vmatprep.subr.mxu1 %v1062_v1  ;;  %936 = vmatprep.subr.mxu0 %v46_v35  ;;  %v58_v46 = vld [vmem:[%s1572_s0 + $0x100] sm:$0xff]  ;;  %v27_v47 = vld [vmem:[%s1572_s0 + $0x8] sm:$0xff]  ;;  %v85_v52 = vcombine.high %v24_v45, %v24_v45  ;;  %v81_v53 = vld [vmem:[%s1572_s0 + $0x1b8] sm:$0xff] }
  0x1a   :  { %186 = vmatpush1.msra.mxu1 %v61_v36  ;;  %937 = vmatpush3.msra.mxu0 %v30_v37  ;;  %v42_v48 = vld [vmem:[%s1572_s0 + $0x80] sm:$0xff]  ;;  %v25_v49 = vld [vmem:[%s1573_s1 + $0x8] sm:$0xff]  ;;  %v80_v55 = vld [vmem:[%s1572_s0 + $0x1b0] sm:$0xff] }
  0x1b   :  { %187 = vmatprep.subr.mxu1 %v1062_v1  ;;  %938 = vmatprep.subr.mxu0 %v45_v38  ;;  %v82_v50 = vld [vmem:[%s1572_s0 + $0x1c0] sm:$0xff]  ;;  %v86_v54 = vcombine.high %v25_v49, %v25_v49  ;;  %v79_v56 = vld [vmem:[%s1572_s0 + $0x1a8] sm:$0xff]  ;;  %v77_v58 = vld [vmem:[%s1572_s0 + $0x198] sm:$0xff] }
  0x1c   :  { %188 = vmatpush1.msra.mxu1 %v60_v39  ;;  %939 = vmatpush3.msra.mxu0 %v29_v40  ;;  %v26_v51 = vld [vmem:[%s1572_s0] sm:$0xff]  ;;  %v76_v59 = vld [vmem:[%s1572_s0 + $0x190] sm:$0xff]  ;;  %v75_v60 = vld [vmem:[%s1572_s0 + $0x188] sm:$0xff] }
  0x1d   :  { %189 = vmatprep.subr.mxu1 %v1062_v1  ;;  %940 = vmatprep.subr.mxu0 %v44_v41  ;;  %v78_v57 = vld [vmem:[%s1572_s0 + $0x1a0] sm:$0xff]  ;;  %v257_v63 = vld [vmem:[%s1574_s2 + $0x78] sm:$0xff]  ;;  %v255_v0 = vld [vmem:[%s1574_s2 + $0x68] sm:$0xff] }
  0x1e   :  { %190 = vmatpush1.msra.mxu1 %v59_v42  ;;  %941 = vmatpush3.msra.mxu0 %v28_v43  ;;  %v74_v61 = vld [vmem:[%s1572_s0 + $0x180] sm:$0xff]  ;;  %v256_v2 = vld [vmem:[%s1574_s2 + $0x70] sm:$0xff]  ;;  %v253_v4 = vld [vmem:[%s1574_s2 + $0x58] sm:$0xff]  ;;  %v261_v42 = vlaneseq }
  0x1f   :  { %191 = vmatprep.subr.mxu1 %v1062_v1  ;;  %942 = vmatprep.subr.mxu0 %v43_v44  ;;  %v254_v3 = vld [vmem:[%s1574_s2 + $0x60] sm:$0xff]  ;;  %v251_v5 = vld [vmem:[%s1574_s2 + $0x48] sm:$0xff]  ;;  %v252_v6 = vld [vmem:[%s1574_s2 + $0x50] sm:$0xff] }
  0x20   :  { %192 = vmatpush1.msra.mxu1 %v58_v46  ;;  %943 = vmatpush3.msra.mxu0 %v27_v47  ;;  %v250_v7 = vld [vmem:[%s1574_s2 + $0x40] sm:$0xff]  ;;  %v249_v8 = vld [vmem:[%s1574_s2 + $0x38] sm:$0xff]  ;;  %v247_v14 = vld [vmem:[%s1574_s2 + $0x28] sm:$0xff]  ;;  %v262_v43 = vshrl.u32 %v261_v42, 7 }
  0x21   :  { %207 = vmatprep.subr.mxu1 %v1062_v1  ;;  %944 = vmatprep.subr.mxu0 %v42_v48  ;;  %v248_v15 = vld [vmem:[%s1574_s2 + $0x30] sm:$0xff]  ;;  %v246_v16 = vld [vmem:[%s1574_s2 + $0x20] sm:$0xff]  ;;  %v245_v17 = vld [vmem:[%s1574_s2 + $0x18] sm:$0xff] }
  0x22   :  { %208 = vmatpush2.msra.mxu1 %v82_v50  ;;  %945 = vmatpush3.msra.mxu0 %v26_v51  ;;  %v243_v18 = vld [vmem:[%s1574_s2 + $0x8] sm:$0xff]  ;;  %v244_v19 = vld [vmem:[%s1574_s2 + $0x10] sm:$0xff]  ;;  %v242_v20 = vld [vmem:[%s1574_s2] sm:$0xff]  ;;  %v263_v44 = vsub.s32 0, %v262_v43 }
  0x23   :  { %209 = vmatprep.subr.mxu1 %v1062_v1  ;;  %155 = vmatprep.mubr.f32.mxu0 %v85_v52  ;;  %v442_v21 = vld [vmem:[%s1575_s3 + $0x78] sm:$0xff]  ;;  %v441_v27 = vld [vmem:[%s1575_s3 + $0x70] sm:$0xff]  ;;  %v440_v28 = vld [vmem:[%s1575_s3 + $0x68] sm:$0xff] }
  0x24   :  { %210 = vmatpush2.msra.mxu1 %v81_v53  ;;  %156 = vmatmul.mubr.f32.vlgmr.msra.gmra.mxu0 %v24_v45  ;;  %v439_v29 = vld [vmem:[%s1575_s3 + $0x60] sm:$0xff]  ;;  %v438_v30 = vld [vmem:[%s1575_s3 + $0x58] sm:$0xff]  ;;  %v437_v31 = vld [vmem:[%s1575_s3 + $0x50] sm:$0xff] }
  0x25   :  { %211 = vmatprep.subr.mxu1 %v1062_v1  ;;  %902 = vmatprep.mubr.msk.f32.mxu1 %vm88_vm0, %v86_v54  ;;  %v436_v32 = vld [vmem:[%s1575_s3 + $0x48] sm:$0xff]  ;;  %v435_v33 = vld [vmem:[%s1575_s3 + $0x40] sm:$0xff]  ;;  %v434_v34 = vld [vmem:[%s1575_s3 + $0x38] sm:$0xff]  ;;  %v267_v54 = vsub.s32 1, %v262_v43 }
  0x26   :  { %212 = vmatpush2.msra.mxu1 %v80_v55  ;;  %420 = vmatprep.mubr.f32.mxu0 %v1062_v1  ;;  %v433_v35 = vld [vmem:[%s1575_s3 + $0x30] sm:$0xff]  ;;  %v432_v36 = vld [vmem:[%s1575_s3 + $0x28] sm:$0xff]  ;;  %v431_v37 = vld [vmem:[%s1575_s3 + $0x20] sm:$0xff] }
  0x27   :  { %213 = vmatprep.subr.mxu1 %v1062_v1  ;;  %380 = vmatprep.subr.mxu0 %v257_v63  ;;  %v430_v38 = vld [vmem:[%s1575_s3 + $0x18] sm:$0xff]  ;;  %v429_v39 = vld [vmem:[%s1575_s3 + $0x10] sm:$0xff]  ;;  %v428_v40 = vld [vmem:[%s1575_s3 + $0x8] sm:$0xff] }
  0x28   :  { %214 = vmatpush2.msra.mxu1 %v79_v56  ;;  %381 = vmatpush1.msra.mxu0 %v256_v2  ;;  %v427_v41 = vld [vmem:[%s1575_s3] sm:$0xff] }
  0x29   :  { %215 = vmatprep.subr.mxu1 %v1062_v1  ;;  %382 = vmatprep.subr.mxu0 %v253_v4  ;;  %v903_v45 = vld [vmem:[%s1574_s2 + $0x80] ss:$8 sm:$0xf] }
  0x2a   :  { %216 = vmatpush2.msra.mxu1 %v78_v57  ;;  %383 = vmatpush1.msra.mxu0 %v252_v6  ;;  %v264_v47 = vrot.slane %v903_v45, %v263_v44  ;;  %v268_v55 = vrot.slane %v903_v45, %v267_v54  ;;  %v709_v42 = vld [vmem:[%s1576_s4 + $0xc0] sm:$0xff]  ;;  %v708_v44 = vld [vmem:[%s1576_s4 + $0xb8] sm:$0xff]  ;;  %v706_v54 = vld [vmem:[%s1576_s4 + $0xa8] sm:$0xff] }
  0x2b   :  { %217 = vmatprep.subr.mxu1 %v1062_v1  ;;  %384 = vmatprep.subr.mxu0 %v249_v8 }
  0x2c   :  { %218 = vmatpush2.msra.mxu1 %v77_v58  ;;  %385 = vmatpush1.msra.mxu0 %v248_v15 }
  0x2d   :  { %219 = vmatprep.subr.mxu1 %v1062_v1  ;;  %386 = vmatprep.subr.mxu0 %v245_v17 }
  0x2e   :  { %220 = vmatpush2.msra.mxu1 %v76_v59  ;;  %387 = vmatpush1.msra.mxu0 %v244_v19 }
  0x2f   :  { %221 = vmatprep.subr.mxu1 %v1062_v1  ;;  %463 = vmatprep.subr.mxu0 %v442_v21 }
  0x30   :  { %222 = vmatpush2.msra.mxu1 %v75_v60 }
  0x31   :  { %223 = vmatprep.subr.mxu1 %v1062_v1 }
  0x32   :  { %224 = vmatpush2.msra.mxu1 %v74_v61 }
  0x33   :  { %226 = vmatmul.mubr.f32.vlgmr.msra.gmra.mxu1 %v25_v49  ;;  %309 = vmatprep.subr.mxu1 %v255_v0 }
  0x34   :  { %349 = vmatprep.mubr.f32.mxu1 %v1062_v1  ;;  %310 = vmatpush1.msra.mxu1 %v254_v3 }
  0x35   :  { %311 = vmatprep.subr.mxu1 %v251_v5 }
  0x36   :  { %312 = vmatpush1.msra.mxu1 %v250_v7 }
  0x37   :  { %313 = vmatprep.subr.mxu1 %v247_v14 }
  0x38   :  { %314 = vmatpush1.msra.mxu1 %v246_v16 }
  0x39   :  { %315 = vmatprep.subr.mxu1 %v243_v18  ;;  %v275_v18 = vsub.s32 3, %v262_v43 }
  0x3a   :  { %316 = vmatpush1.msra.mxu1 %v242_v20 }
  0x3b   :  { %563 = vmatprep.subr.mxu1 %v442_v21  ;;  %v276_v19 = vrot.slane %v903_v45, %v275_v18 }
  0xe4   :  { %v946_v62 = vpop.f32.mrf.mxu0 }
  0xe6   :  { %v947_v9 = vpop.f32.mrf.mxu0 }
  0xe7   :  { %v948_v10 = vadd.f32 %v947_v9, %v946_v62 }
  0xf3   :  { %v227_v11 = vpop.f32.mrf.mxu1 }
  0xf4   :  { %v228_v12 = vadd.f32 %v948_v10, %v227_v11 }
  0xf5   :  { %v229_v13 = vpop.f32.mrf.mxu1 }
  0xf6   :  { %232 = vrot.lane.b32.xlu0 %v228_v12, %s1063_s10 }
 0x168   :  { %v233_v22 = vpop.permute.xlu0 %232 }
 0x169   :  { %v235_v23 = vmax.f32 %v228_v12, %v233_v22  ;;  %v271_v12 = vsub.s32 2, %v262_v43  ;;  %v693_v43 = vld [vmem:[%s1576_s4 + $0x40] sm:$0xff] }
 0x16b   :  { %237 = vrot.lane.b32.xlu0 %v235_v23, %s1064_s26  ;;  %v272_v13 = vrot.slane %v903_v45, %v271_v12  ;;  %v692_v45 = vld [vmem:[%s1576_s4 + $0x38] sm:$0xff] }
 0x1dd   :  { %v238_v24 = vpop.permute.xlu0 %237 }
 0x1de   :  { %v240_v25 = vmax.f32 %v235_v23, %v238_v24 }
 0x1e0   :  { %v241_v26 = vmax.f32 %v240_v25, 0.0 }
 0x1e2   :  { %904 = vmatmul.mubr.msk.f32.vlgmr.msra.gmra.mxu1 %vm281_vm1, %v241_v26  ;;  %905 = vmatmul.mubr.msk.f32.vlgmr.msra.gmra.mxu0 %vm281_vm1, %v241_v26 }
 0x1e3   :  { %464 = vmatpush1.msra.mxu0 %v441_v27  ;;  %511 = vmatprep.mubr.f32.mxu0 %v1062_v1 }
 0x1e4   :  { %465 = vmatprep.subr.mxu0 %v440_v28  ;;  %564 = vmatpush1.msra.mxu1 %v441_v27 }
 0x1e5   :  { %466 = vmatpush1.msra.mxu0 %v439_v29  ;;  %565 = vmatprep.subr.mxu1 %v440_v28  ;;  %v716_v28 = vld [vmem:[%s1576_s4 + $0xf8] sm:$0xff] }
 0x1e6   :  { %467 = vmatprep.subr.mxu0 %v438_v30  ;;  %566 = vmatpush1.msra.mxu1 %v439_v29  ;;  %v700_v29 = vld [vmem:[%s1576_s4 + $0x78] sm:$0xff] }
 0x1e7   :  { %468 = vmatpush1.msra.mxu0 %v437_v31  ;;  %567 = vmatprep.subr.mxu1 %v438_v30  ;;  %v715_v30 = vld [vmem:[%s1576_s4 + $0xf0] sm:$0xff] }
 0x1e8   :  { %469 = vmatprep.subr.mxu0 %v436_v32  ;;  %568 = vmatpush1.msra.mxu1 %v437_v31  ;;  %v699_v31 = vld [vmem:[%s1576_s4 + $0x70] sm:$0xff] }
 0x1e9   :  { %470 = vmatpush1.msra.mxu0 %v435_v33  ;;  %569 = vmatprep.subr.mxu1 %v436_v32  ;;  %v714_v32 = vld [vmem:[%s1576_s4 + $0xe8] sm:$0xff] }
 0x1ea   :  { %471 = vmatprep.subr.mxu0 %v434_v34  ;;  %570 = vmatpush1.msra.mxu1 %v435_v33  ;;  %v698_v33 = vld [vmem:[%s1576_s4 + $0x68] sm:$0xff] }
 0x1eb   :  { %472 = vmatpush1.msra.mxu0 %v433_v35  ;;  %571 = vmatprep.subr.mxu1 %v434_v34  ;;  %v713_v34 = vld [vmem:[%s1576_s4 + $0xe0] sm:$0xff] }
 0x1ec   :  { %473 = vmatprep.subr.mxu0 %v432_v36  ;;  %572 = vmatpush1.msra.mxu1 %v433_v35  ;;  %v697_v35 = vld [vmem:[%s1576_s4 + $0x60] sm:$0xff] }
 0x1ed   :  { %474 = vmatpush1.msra.mxu0 %v431_v37  ;;  %573 = vmatprep.subr.mxu1 %v432_v36  ;;  %v712_v36 = vld [vmem:[%s1576_s4 + $0xd8] sm:$0xff] }
 0x1ee   :  { %475 = vmatprep.subr.mxu0 %v430_v38  ;;  %574 = vmatpush1.msra.mxu1 %v431_v37  ;;  %v696_v37 = vld [vmem:[%s1576_s4 + $0x58] sm:$0xff] }
 0x1ef   :  { %476 = vmatpush1.msra.mxu0 %v429_v39  ;;  %575 = vmatprep.subr.mxu1 %v430_v38  ;;  %v711_v38 = vld [vmem:[%s1576_s4 + $0xd0] sm:$0xff] }
 0x1f0   :  { %477 = vmatprep.subr.mxu0 %v428_v40  ;;  %576 = vmatpush1.msra.mxu1 %v429_v39  ;;  %v695_v39 = vld [vmem:[%s1576_s4 + $0x50] sm:$0xff] }
 0x1f1   :  { %478 = vmatpush1.msra.mxu0 %v427_v41  ;;  %577 = vmatprep.subr.mxu1 %v428_v40  ;;  %v710_v40 = vld [vmem:[%s1576_s4 + $0xc8] sm:$0xff] }
 0x1f2   :  { %512 = vmatmul.mubr.f32.vlgmr.msra.gmra.mxu0 %v1062_v1  ;;  %578 = vmatpush1.msra.mxu1 %v427_v41  ;;  %v694_v41 = vld [vmem:[%s1576_s4 + $0x48] sm:$0xff] }
 0x1f3   :  { %611 = vmatprep.mubr.f32.mxu1 %v1062_v1  ;;  %989 = vmatprep.subr.mxu1 %v1062_v1 }
 0x1f4   :  { %949 = vmatprep.subr.mxu0 %v716_v28 }
 0x1f5   :  { %950 = vmatpush3.msra.mxu0 %v700_v29 }
 0x1f6   :  { %951 = vmatprep.subr.mxu0 %v715_v30 }
 0x1f7   :  { %952 = vmatpush3.msra.mxu0 %v699_v31 }
 0x1f8   :  { %953 = vmatprep.subr.mxu0 %v714_v32 }
 0x1f9   :  { %954 = vmatpush3.msra.mxu0 %v698_v33 }
 0x1fa   :  { %955 = vmatprep.subr.mxu0 %v713_v34  ;;  %v795_v34 = vld [vmem:[%s1577_s5 + $0x10] sm:$0xff] }
 0x1fb   :  { %956 = vmatpush3.msra.mxu0 %v697_v35  ;;  %v794_v35 = vld [vmem:[%s1577_s5 + $0x8] sm:$0xff] }
 0x1fc   :  { %957 = vmatprep.subr.mxu0 %v712_v36  ;;  %v793_v36 = vld [vmem:[%s1577_s5] sm:$0xff] }
 0x1fd   :  { %958 = vmatpush3.msra.mxu0 %v696_v37 }
 0x1fe   :  { %959 = vmatprep.subr.mxu0 %v711_v38  ;;  %v911_v38 = vld [vmem:[%s1576_s4 + $0x100] ss:$0 sm:$0xff] }
 0x1ff   :  { %960 = vmatpush3.msra.mxu0 %v695_v39 }
 0x200   :  { %961 = vmatprep.subr.mxu0 %v710_v40 }
 0x201   :  { %962 = vmatpush3.msra.mxu0 %v694_v41 }
 0x202   :  { %963 = vmatprep.subr.mxu0 %v709_v42 }
 0x203   :  { %964 = vmatpush3.msra.mxu0 %v693_v43  ;;  %v912_v43 = vld [vmem:[%s1577_s5 + $0x20] ss:$0 sm:$0xff] }
 0x204   :  { %965 = vmatprep.subr.mxu0 %v708_v44 }
 0x205   :  { %966 = vmatpush3.msra.mxu0 %v692_v45 }
 0x2a2   :  { %v422_v46 = vpop.f32.mrf.mxu0  ;;  %v351_v48 = vpop.f32.mrf.mxu1 }
 0x2a3   :  { %v352_v50 = vadd.f32 %v351_v48, %v264_v47  ;;  %v423_v14 = vadd.f32 %v422_v46, %v272_v13  ;;  %v707_v46 = vld [vmem:[%s1576_s4 + $0xb0] sm:$0xff] }
 0x2a4   :  { %v424_v49 = vpop.f32.mrf.mxu0  ;;  %v353_v56 = vpop.f32.mrf.mxu1  ;;  %967 = vmatprep.subr.mxu0 %v707_v46 }
 0x2a5   :  { %v354_v58 = vadd.f32 %v353_v56, %v268_v55  ;;  %v425_v21 = vadd.f32 %v424_v49, %v276_v19  ;;  %v690_v55 = vld [vmem:[%s1576_s4 + $0x28] sm:$0xff]  ;;  %v705_v56 = vld [vmem:[%s1576_s4 + $0xa0] sm:$0xff] }
 0x2b2   :  { %v513_v51 = vpop.f32.mrf.mxu0 }
 0x2b3   :  { %v518_v52 = vadd.f32 %v513_v51, %v352_v50 }
 0x2b4   :  { %v515_v57 = vpop.f32.mrf.mxu0 }
 0x2b5   :  { %v906_v53 = vmul.f32 -1.442695, %v518_v52  ;;  %v519_v59 = vadd.f32 %v515_v57, %v354_v58  ;;  %v689_v57 = vld [vmem:[%s1576_s4 + $0x20] sm:$0xff]  ;;  %v704_v58 = vld [vmem:[%s1576_s4 + $0x98] sm:$0xff] }
 0x2b7   :  { %1012 = vpow2.f32 %v906_v53  ;;  %v907_v2 = vmul.f32 -1.442695, %v519_v59  ;;  %v691_v53 = vld [vmem:[%s1576_s4 + $0x30] sm:$0xff] }
 0x2b8   :  { %1014 = vtanh.f32 %v519_v59  ;;  %968 = vmatpush3.msra.mxu0 %v691_v53  ;;  %v688_v59 = vld [vmem:[%s1576_s4 + $0x18] sm:$0xff] }
 0x2b9   :  { %969 = vmatprep.subr.mxu0 %v706_v54 }
 0x2ba   :  { %970 = vmatpush3.msra.mxu0 %v690_v55 }
 0x2bb   :  { %971 = vmatprep.subr.mxu0 %v705_v56 }
 0x2bc   :  { %972 = vmatpush3.msra.mxu0 %v689_v57 }
 0x2bd   :  { %973 = vmatprep.subr.mxu0 %v704_v58 }
 0x2be   :  { %974 = vmatpush3.msra.mxu0 %v688_v59 }
 0x2c4   :  { %v1013_v60 = vpop.eup %1012 }
 0x2c5   :  { %v523_v61 = vadd.f32 1.0, %v1013_v60  ;;  %v1015_v62 = vpop.eup %1014  ;;  %v703_v60 = vld [vmem:[%s1576_s4 + $0x90] sm:$0xff] }
 0x2c6   :  { %975 = vmatprep.subr.mxu0 %v703_v60 }
 0x2c7   :  { %1016 = vrcp.f32 %v523_v61  ;;  %v687_v61 = vld [vmem:[%s1576_s4 + $0x10] sm:$0xff] }
 0x2c8   :  { %1018 = vpow2.f32 %v907_v2  ;;  %976 = vmatpush3.msra.mxu0 %v687_v61  ;;  %v701_v2 = vld [vmem:[%s1576_s4 + $0x80] sm:$0xff] }
 0x2d4   :  { %v1017_v63 = vpop.eup %1016 }
 0x2d5   :  { %v534_v0 = vmul.f32 %v1017_v63, %v1015_v62  ;;  %v1019_v3 = vpop.eup %1018  ;;  %v533_v5 = vmul.f32 0.0, %v1017_v63  ;;  %v702_v62 = vld [vmem:[%s1576_s4 + $0x88] sm:$0xff] }
 0x2d6   :  { %v530_v4 = vadd.f32 1.0, %v1019_v3  ;;  %v686_v63 = vld [vmem:[%s1576_s4 + $0x8] sm:$0xff]  ;;  %977 = vmatprep.subr.mxu0 %v702_v62 }
 0x2d7   :  { %536 = vrot.lane.b32.xlu1 %v534_v0, %s1064_s26  ;;  %978 = vmatpush3.msra.mxu0 %v686_v63 }
 0x2d8   :  { %1020 = vrcp.f32 %v530_v4  ;;  %v685_v4 = vld [vmem:[%s1576_s4] sm:$0xff]  ;;  %979 = vmatprep.subr.mxu0 %v701_v2  ;;  %s1066_s4 = smov [#allocation2]  }
 0x2d9   :  { %980 = vmatpush3.msra.mxu0 %v685_v4  ;;  %s894_s28 = sshll.u32 %s1066_s4, 4  ;;  %s895_s28 = int_to_ptr.vmem [resolvable:$true] %s894_s28 }
 0x2da   :  { %p1045_p1 = scmp.lt.s32.totalorder %s895_s28, %s895_s28 }
 0x2e5   :  { %v1021_v8 = vpop.eup %1020 }
 0x349   :  { %v537_v6 = vpop.permute.xlu1 %536 }
 0x34a   :  { %v1413_v7 = vadd.f32 %v537_v6, %v533_v5 }
 0x34c   :  { %1022 = vtanh.f32 %v1413_v7 }
 0x359   :  { %v1023_v9 = vpop.eup %1022 }
 0x35a   :  { %v1416_v10 = vmul.f32 %v1023_v9, %v1021_v8 }
 0x35c   :  { %543 = vrot.lane.b32.xlu1 %v1416_v10, %s1064_s26  ;;  %v651_v6 = vrot.slane %v1416_v10, 2  ;;  %v647_v12 = vrot.slane %v1416_v10, 1 }
 0x3ce   :  { %v1420_v11 = vpop.permute.xlu1 %543 }
 0x3cf   :  { %908 = vmatmul.mubr.msk.f32.vlgmr.msra.gmra.mxu1 %vm443_vm2, %v1420_v11 }
 0x3d0   :  { %997 = vmatprep.mubr.msk.f32.mxu1 %vm1065_vm5, %v1062_v1 }
 0x48f   :  { %v613_v15 = vpop.f32.mrf.mxu1 }
 0x490   :  { %v618_v16 = vadd.f32 %v613_v15, %v423_v14 }
 0x491   :  { %v615_v20 = vpop.f32.mrf.mxu1 }
 0x492   :  { %v909_v17 = vmul.f32 -1.442695, %v618_v16  ;;  %v619_v22 = vadd.f32 %v615_v20, %v425_v21 }
 0x494   :  { %1024 = vpow2.f32 %v909_v17  ;;  %v910_v47 = vmul.f32 -1.442695, %v619_v22 }
 0x495   :  { %1026 = vtanh.f32 %v619_v22 }
 0x4a1   :  { %v1025_v23 = vpop.eup %1024 }
 0x4a2   :  { %v623_v24 = vadd.f32 1.0, %v1025_v23  ;;  %v1027_v25 = vpop.eup %1026 }
 0x4a4   :  { %1028 = vrcp.f32 %v623_v24 }
 0x4a5   :  { %1030 = vpow2.f32 %v910_v47 }
 0x4b1   :  { %v1029_v26 = vpop.eup %1028 }
 0x4b2   :  { %v634_v27 = vmul.f32 %v1029_v26, %v1027_v25  ;;  %v1031_v48 = vpop.eup %1030  ;;  %v633_v50 = vmul.f32 %v1029_v26, %v1413_v7  ;;  %v659_v25 = vrot.slane %v1416_v10, 3  ;;  %v796_v10 = vld [vmem:[%s1577_s5 + $0x18] sm:$0xff]  ;;  %s1040_s5 = scalar_lea.vmem %s895_s28, 32 }
 0x4b3   :  { %v630_v49 = vadd.f32 1.0, %v1031_v48  ;;  %990 = vmatpush3.msra.mxu1 %v796_v10  ;;  %p1041_p0 = scmp.ne.s32.totalorder %s895_s28, %s1040_s5  ;;  %p1046_p2 = scmp.lt.s32.totalorder %s1040_s5, %s1040_s5 }
 0x4b4   :  { %636 = vrot.lane.b32.xlu0 %v634_v27, %s1064_s26  ;;  %991 = vmatprep.subr.mxu1 %v1062_v1 }
 0x4b5   :  { %1032 = vrcp.f32 %v630_v49  ;;  %992 = vmatpush3.msra.mxu1 %v795_v34  ;;  %p1047_p3 = por %p1046_p2, %p1045_p1 }
 0x4b6   :  { %993 = vmatprep.subr.mxu1 %v1062_v1 }
 0x4b7   :  { %994 = vmatpush3.msra.mxu1 %v794_v35  ;;  %p1048_p4 = pnand %p1047_p3, %p1041_p0 }
 0x4b8   :  { %995 = vmatprep.subr.mxu1 %v1062_v1 }
 0x4b9   :  { %996 = vmatpush3.msra.mxu1 %v793_v36 }
 0x4c2   :  { %v1033_v0 = vpop.eup %1032 }
 0x526   :  { %v637_v51 = vpop.permute.xlu0 %636 }
 0x527   :  { %v639_v52 = vadd.f32 %v637_v51, %v633_v50 }
 0x529   :  { %1034 = vtanh.f32 %v639_v52 }
 0x536   :  { %v1035_v3 = vpop.eup %1034 }
 0x537   :  { %v641_v5 = vmul.f32 %v1035_v3, %v1033_v0 }
 0x539   :  { %644 = vrot.lane.b32.xlu0 %v641_v5, %s1064_s26  ;;  %v655_v7 = vrot.slane %v641_v5, 2  ;;  %v649_v13 = vrot.slane %v641_v5, 1  ;;  %v661_v24 = vrot.slane %v641_v5, 3 }
 0x53b   :  { %v1005_v8 = vpack.i.bf16 %v655_v7, %v651_v6 }
 0x53d   :  { %1006 = vrot.lane.b32.xlu1 %v1005_v8, %s1064_s26 }
 0x5ab   :  { %v645_v9 = vpop.permute.xlu0 %644 }
 0x5ac   :  { %v663_v14 = vsel %vm281_vm1, %v1420_v11, %v645_v9  ;;  %v670_v15 = vsel %vm281_vm1, %v645_v9, %v1420_v11 }
 0x5ad   :  { %v664_v16 = vsel %vm443_vm2, %v663_v14, %v647_v12  ;;  %v671_v17 = vsel %vm443_vm2, %v670_v15, %v649_v13 }
 0x5ae   :  { %v672_v18 = vsel %vm665_vm3, %v671_v17, %v647_v12  ;;  %v666_v19 = vsel %vm665_vm3, %v664_v16, %v649_v13 }
 0x5af   :  { %v678_v20 = vrot.slane %v672_v18, 7  ;;  %v1007_v21 = vpop.permute.xlu1 %1006 }
 0x5b0   :  { %v1009_v22 = vunpack.i.h.bf16 %v1007_v21  ;;  %v1008_v23 = vunpack.i.l.bf16 %v1007_v21 }
 0x5b1   :  { %v683_v26 = vsel %vm682_vm4, %v666_v19, %v678_v20 }
 0x5b2   :  { %v667_v11 = vsel %vm281_vm1, %v1008_v23, %v1009_v22  ;;  %v673_v27 = vsel %vm281_vm1, %v1009_v22, %v1008_v23 }
 0x5b3   :  { %v674_v28 = vsel %vm443_vm2, %v673_v27, %v661_v24  ;;  %v668_v29 = vsel %vm443_vm2, %v667_v11, %v659_v25 }
 0x5b4   :  { %v669_v30 = vsel %vm665_vm3, %v668_v29, %v661_v24  ;;  %v675_v31 = vsel %vm665_vm3, %v674_v28, %v659_v25 }
 0x5b5   :  { %v679_v32 = vrot.slane %v675_v31, 7 }
 0x5b7   :  { %v684_v33 = vsel %vm682_vm4, %v669_v30, %v679_v32 }
 0x5b8   :  { %786 = vmatprep.mubr.f32.mxu0 %v684_v33 }
 0x5b9   :  { %787 = vmatmul.mubr.f32.vlgmr.msra.gmra.mxu0 %v683_v26 }
 0x679   :  { %v981_v37 = vpop.f32.mrf.mxu0 }
 0x67b   :  { %v982_v39 = vpop.f32.mrf.mxu0 }
 0x67c   :  { %v983_v40 = vadd.f32 %v982_v39, %v981_v37 }
 0x67e   :  { %v789_v41 = vadd.f32 %v983_v40, %v911_v38 }
 0x680   :  { %v792_v42 = vmax.f32 %v789_v41, 0.0 }
 0x682   :  { %998 = vmatmul.mubr.msk.f32.vlgmr.msra.gmra.mxu1 %vm281_vm1, %v792_v42 }
 0x742   :  { %v871_v44 = vpop.f32.mrf.mxu1 }
 0x743   :  { %v872_v45 = vadd.f32 %v912_v43, %v871_v44 }
 0x744   :  { %v999_v1 = vpop.f32.mrf.mxu1 }
 0x745   :  { %v876_v46 = vsel %vm875_vm6, %v872_v45, -inf }
 0x746   :  { %877 = vmax.xlane.f32.xlu1 %v876_v46 }
 0x7cf   :  { %v878_v47 = vpop.xlane.xlu1 %877 }
 0x7d0   :  { %v879_v48 = vsub.f32 %v872_v45, %v878_v47 }
 0x7d2   :  { %v880_v49 = vmul.f32 1.442695, %v879_v48 }
 0x7d4   :  { %1036 = vpow2.f32 %v880_v49 }
 0x7e1   :  { %v1037_v50 = vpop.eup %1036 }
 0x7e2   :  { %v882_v51 = vsel %vm875_vm6, %v1037_v50, 0.0 }
 0x7e3   :  { %883 = vadd.xlane.f32.xlu0 %v882_v51 }
 0x86c   :  { %v884_v52 = vpop.xlane.xlu0 %883 }
 0x86d   :  { %1038 = vrcp.f32 %v884_v52 }
 0x87a   :  { %v1039_v53 = vpop.eup %1038 }
 0x87b   :  { %v886_v54 = vmul.f32 %v1039_v53, %v1037_v50 }
 0x87d   :  { %887 = vst.msk [vmem:[#allocation2] sm:$0x3] %vm875_vm6, %v886_v54 }
 0x87e   :  { %1051 = shalt.err (!%p1048_p4)
}
 0x87f   :  { %897 = dma.vmem_to_hbm [thread:$0]  %s895_s28, 32, %s1578_s6, [#allocation3]  }
 0x880   :  { %1060 = dma.done.wait [#allocation3], 32  }
 0x881   :  { %1061 = vsyncadd [#allocation3], 4294967264 }
 0x882   :  { %901 = vsyncpa [#allocation3], 1 }

</bundles_post_ra>
